<compile_context>
chip_gen: v7x
topology: tpu7x:2x2x1
jax: 0.10.0
libtpu: 0.0.40
codegen_flags: <defaults>
</compile_context>

<pallas_src>
import functools

import jax
import jax.numpy as jnp
from jax import lax
from jax.experimental import pallas as pl
from jax.experimental.pallas import tpu as pltpu


# ----------------------------------------------------------------------------
# Phase 1: streaming masked row-sum (grid = (parts, tiles_per_part))
# ----------------------------------------------------------------------------
def _reduce_kernel(nrows_ref, emb_ref, part_ref, *, tiles_per_part):
    # nrows_ref: SMEM (1,) int32  -- number of valid (folded) rows
    # emb_ref:   VMEM (tile, dl)  -- one streamed tile (tail/clamped tiles masked)
    # part_ref:  VMEM (1, 8, dl) f32 -- per-part partial sum (resident over t)
    p = pl.program_id(0)
    t = pl.program_id(1)
    tile, dl = emb_ref.shape

    @pl.when(t == 0)
    def _():
        part_ref[...] = jnp.zeros_like(part_ref)

    x = emb_ref[...].astype(jnp.float32)                     # cast on load (VPU)
    base = (p * tiles_per_part + t) * tile                    # UNclamped global row base
    rows = base + lax.broadcasted_iota(jnp.int32, (tile, dl), 0)
    x = jnp.where(rows < nrows_ref[0], x, 0.0)                # tail / OOB mask

    if tile % 8 == 0:
        # Pure vreg adds: (tile//8, 8, dl) slabs summed over the major axis.
        psum8 = x.reshape(tile // 8, 8, dl).sum(axis=0)       # (8, dl)
    else:
        # Tiny single-tile path (whole array < 8 rows of blocks): sublane reduce.
        psum8 = jnp.where(
            lax.broadcasted_iota(jnp.int32, (8, dl), 0) == 0,
            jnp.sum(x, axis=0, keepdims=True), 0.0)           # (8, dl), row 0 holds sum

    part_ref[0] += psum8


# ----------------------------------------------------------------------------
# Phase 2: tiny epilogue -- combine partials, drop row 0, tanh/fc2/softmax
# ----------------------------------------------------------------------------
def _epilogue_kernel(inv_ref, part_ref, row0_ref, w_ref, b_ref, o_ref):
    # inv_ref: SMEM (1,) f32 = 1/(N-1); part_ref: (P, 8, dl); row0_ref: (1, d)
    # w_ref: (2, d) PyTorch-native nn.Linear layout; b_ref: (1, 2); o_ref: (1, 2)
    _, d = row0_ref.shape
    dl = part_ref.shape[-1]
    fold = dl // d

    tot8 = jnp.sum(part_ref[...], axis=0)                    # (8, dl) combine TCs
    tot = jnp.sum(tot8, axis=0, keepdims=True)                # (1, dl) single XLU reduce

    # Fold lanes back: (1, fold*d) -> (1, d) via static lane slices (runs once).
    acc = tot[:, 0:d]
    for k in range(1, fold):
        acc = acc + tot[:, k * d:(k + 1) * d]

    acc = acc - row0_ref[...].astype(jnp.float32)             # exclude row 0
    mean = acc * inv_ref[0]                                    # * 1/(N-1)
    h = jnp.tanh(mean)                                         # (1, d), EUP

    # fc2 as two lane reductions (MXU pointless for (1,d)x(d,2)).
    w = w_ref[...].astype(jnp.float32)                         # (2, d)
    l0 = jnp.sum(h * w[0:1, :], axis=-1, keepdims=True)        # (1, 1)
    l1 = jnp.sum(h * w[1:2, :], axis=-1, keepdims=True)        # (1, 1)
    logits = jnp.concatenate([l0, l1], axis=-1) + b_ref[...]   # (1, 2)

    # Softmax, max-stabilized, exact divide (runs once -- exactness is free).
    m = jnp.max(logits, axis=-1, keepdims=True)
    e = jnp.exp(logits - m)
    o_ref[...] = e / jnp.sum(e, axis=-1, keepdims=True)


# ----------------------------------------------------------------------------
# Wrapper
# ----------------------------------------------------------------------------
def net_head(updated_embedding, w_fc2, b_fc2, *, block_rows=16 * 1024, num_parts=2):
    """updated_embedding: (N, D) float (row 0 excluded from the mean);
    w_fc2: (2, D) PyTorch-native nn.Linear weight; b_fc2: (2,)."""
    n, d = updated_embedding.shape
    if n < 2:
        raise ValueError("need N >= 2: row 0 is excluded from the mean")

    # Lane folding: (N, d) -> (N/f, f*d) so 128-wide lanes are dense (free,
    # row-major contiguous reshape). Falls back to unfolded when not divisible.
    fold = 1
    if d < 128 and 128 % d == 0 and n % (128 // d) == 0:
        fold = 128 // d
    n_fold, dl = n // fold, d * fold
    emb = updated_embedding.reshape(n_fold, dl) if fold > 1 else updated_embedding

    # Reduction tiling: no padding; tail rows are masked in-kernel.
    #   block_rows folded rows * 128 lanes * 4 B ~= 8 MiB f32 per buffer.
    tile = block_rows if n_fold >= block_rows else n_fold
    n_tiles = pl.cdiv(n_fold, tile)
    parts = max(1, min(num_parts, n_tiles))        # megacore split only when useful
    tiles_per_part = pl.cdiv(n_tiles, parts)
    last_tile = n_tiles - 1

    nrows = jnp.asarray([n_fold], jnp.int32)       # SMEM scalar (scalar prefetch)

    partials = pl.pallas_call(
        functools.partial(_reduce_kernel, tiles_per_part=tiles_per_part),
        out_shape=jax.ShapeDtypeStruct((parts, 8, dl), jnp.float32),
        grid_spec=pltpu.PrefetchScalarGridSpec(
            num_scalar_prefetch=1,
            grid=(parts, tiles_per_part),
            in_specs=[pl.BlockSpec(
                (tile, dl),
                # Clamp over-shooting (padded) tiles onto the last real tile;
                # the in-kernel row mask zeroes their contribution.
                lambda p, t, nr: (jnp.minimum(p * tiles_per_part + t, last_tile), 0))],
            out_specs=pl.BlockSpec((1, 8, dl), lambda p, t, nr: (p, 0, 0)),
        ),
        compiler_params=pltpu.CompilerParams(
            dimension_semantics=("parallel", "arbitrary"),
            vmem_limit_bytes=32 * 1024 * 1024,     # 2 x 8 MiB buffers + slack; v7x-safe
        ),
    )(nrows, emb)

    inv_nm1 = jnp.asarray([1.0 / (n - 1)], jnp.float32)
    row0 = updated_embedding[0:1, :]               # tiny (1, d) slice for row-0 exclusion
    b2 = jnp.asarray(b_fc2, jnp.float32).reshape(1, 2)

    return pl.pallas_call(
        _epilogue_kernel,
        out_shape=jax.ShapeDtypeStruct((1, 2), jnp.float32),
        in_specs=[
            pl.BlockSpec(memory_space=pltpu.MemorySpace.SMEM),   # inv_nm1
            pl.BlockSpec(memory_space=pltpu.MemorySpace.VMEM),   # partials
            pl.BlockSpec(memory_space=pltpu.MemorySpace.VMEM),   # row0
            pl.BlockSpec(memory_space=pltpu.MemorySpace.VMEM),   # w_fc2
            pl.BlockSpec(memory_space=pltpu.MemorySpace.VMEM),   # bias
        ],
        out_specs=pl.BlockSpec(memory_space=pltpu.MemorySpace.VMEM),
    )(inv_nm1, partials, row0, w_fc2, b2)


def _reference(emb, w, b):
    mean = jnp.mean(emb[1:].astype(jnp.float32), axis=0)
    logits = jnp.sum(jnp.tanh(mean)[None, :] * w.astype(jnp.float32), axis=-1) + b
    return jax.nn.softmax(logits.reshape(1, -1), axis=-1)


if __name__ == "__main__":
    key = jax.random.PRNGKey(0)
    k_emb, k_w, k_b = jax.random.split(key, 3)

    N_NODES = 8       # rows of updated_embedding (row 0 is skipped by the mean)
    MEMORY_DIM = 32   # args.memory_dim

    updated_embedding = jax.random.normal(k_emb, (N_NODES, MEMORY_DIM), jnp.float32)
    bound = 1.0 / (MEMORY_DIM ** 0.5)
    w_fc2 = jax.random.uniform(k_w, (2, MEMORY_DIM), jnp.float32, -bound, bound)
    b_fc2 = jax.random.uniform(k_b, (2,), jnp.float32, -bound, bound)

    out = jax.block_until_ready(net_head(updated_embedding, w_fc2, b_fc2))
    ref = _reference(updated_embedding, w_fc2, b_fc2)
    assert out.shape == (1, 2)
    assert abs(float(jnp.sum(out)) - 1.0) < 1e-5        # exact softmax divide
    assert jnp.allclose(out, ref, atol=1e-4, rtol=1e-4)

    # Extra small-shape checks: multi-tile streaming, in-kernel tail masking,
    # the 2-way "parallel" split, and the non-foldable (N % 4 != 0) path.
    for n_extra in (1000, 1003):
        emb2 = jax.random.normal(jax.random.PRNGKey(n_extra),
                                 (n_extra, MEMORY_DIM), jnp.float32)
        got = jax.block_until_ready(net_head(emb2, w_fc2, b_fc2, block_rows=64))
        want = _reference(emb2, w_fc2, b_fc2)
        assert jnp.allclose(got, want, atol=1e-4, rtol=1e-4)

    print("KERNEL_OK")
</pallas_src>

<mosaic_0001>
module attributes {stable_mosaic.version = 11 : i64} {
  func.func @_reduce_kernel(%arg0: i32, %arg1: i32, %arg2: memref<1xi32, #tpu.memory_space<smem>>, %arg3: memref<2x128xf32, #tpu.memory_space<vmem>>, %arg4: memref<1x8x128xf32, #tpu.memory_space<vmem>>) attributes {dimension_semantics = [#tpu.dimension_semantics<parallel>, #tpu.dimension_semantics<arbitrary>], iteration_bounds = array<i64: 1, 1>, scalar_prefetch = 1 : i64, scratch_operands = 0 : i64, tpu.core_type = #tpu.core_type<tc>, window_params = [{transform_indices = @transform_0, window_bounds = array<i64: 2, 128>}, {transform_indices = @transform_1, window_bounds = array<i64: 1, 8, 128>}]} {
    %c0_i32 = arith.constant 0 : i32
    %0 = arith.cmpi eq, %arg1, %c0_i32 : i32
    %1 = arith.extui %0 : i1 to i32
    %c0_i32_0 = arith.constant 0 : i32
    %2 = arith.cmpi ne, %1, %c0_i32_0 : i32
    scf.if %2 {
      %cst_12 = arith.constant 0.000000e+00 : f32
      %30 = vector.broadcast %cst_12 : f32 to vector<1x8x128xf32>
      %c0_13 = arith.constant 0 : index
      %c0_14 = arith.constant 0 : index
      %c0_15 = arith.constant 0 : index
      %31 = vector.load %arg4[%c0_13, %c0_14, %c0_15] : memref<1x8x128xf32, #tpu.memory_space<vmem>>, vector<1x8x128xf32>
      tpu.vector_store %arg4[%c0_13, %c0_14, %c0_15], %30 {strides = array<i32>} : memref<1x8x128xf32, #tpu.memory_space<vmem>>, vector<1x8x128xf32>,
    } else {
    }
    %c0 = arith.constant 0 : index
    %c0_1 = arith.constant 0 : index
    %3 = vector.load %arg3[%c0, %c0_1] : memref<2x128xf32, #tpu.memory_space<vmem>>, vector<2x128xf32>
    %c1_i32 = arith.constant 1 : i32
    %4 = arith.muli %arg0, %c1_i32 : i32
    %5 = arith.addi %4, %arg1 : i32
    %c2_i32 = arith.constant 2 : i32
    %6 = arith.muli %5, %c2_i32 : i32
    %7 = tpu.iota {dimensions = array<i32: 0>} : vector<2x128xi32>
    %8 = vector.broadcast %6 : i32 to vector<2x128xi32>
    %9 = arith.addi %8, %7 : vector<2x128xi32>
    %c0_2 = arith.constant 0 : index
    %10 = memref.load %arg2[%c0_2] : memref<1xi32, #tpu.memory_space<smem>>
    %11 = vector.broadcast %10 : i32 to vector<2x128xi32>
    %12 = arith.cmpi slt, %9, %11 : vector<2x128xi32>
    %cst = arith.constant 0.000000e+00 : f32
    %13 = vector.broadcast %cst : f32 to vector<2x128xf32>
    %14 = arith.select %12, %3, %13 : vector<2x128xi1>, vector<2x128xf32>
    %15 = tpu.iota {dimensions = array<i32: 0>} : vector<8x128xi32>
    %c0_i32_3 = arith.constant 0 : i32
    %16 = vector.broadcast %c0_i32_3 : i32 to vector<8x128xi32>
    %17 = arith.cmpi eq, %15, %16 : vector<8x128xi32>
    %cst_4 = arith.constant dense<0.000000e+00> : vector<128xf32>
    %18 = vector.multi_reduction <add>, %14, %cst_4 [0] : vector<2x128xf32> to vector<128xf32>
    %19 = vector.shape_cast %18 : vector<128xf32> to vector<1x128xf32>
    %cst_5 = arith.constant 0.000000e+00 : f32
    %20 = vector.shape_cast %19 : vector<1x128xf32> to vector<1x128xf32>
    %21 = vector.broadcast %20 : vector<1x128xf32> to vector<8x128xf32>
    %22 = vector.broadcast %cst_5 : f32 to vector<8x128xf32>
    %23 = arith.select %17, %21, %22 : vector<8x128xi1>, vector<8x128xf32>
    %c0_6 = arith.constant 0 : index
    %c0_7 = arith.constant 0 : index
    %c0_8 = arith.constant 0 : index
    %24 = vector.load %arg4[%c0_6, %c0_7, %c0_8] : memref<1x8x128xf32, #tpu.memory_space<vmem>>, vector<1x8x128xf32>
    %25 = vector.shape_cast %24 : vector<1x8x128xf32> to vector<8x128xf32>
    %26 = arith.addf %25, %23 : vector<8x128xf32>
    %c0_9 = arith.constant 0 : index
    %c0_10 = arith.constant 0 : index
    %c0_11 = arith.constant 0 : index
    %27 = vector.load %arg4[%c0_9, %c0_10, %c0_11] : memref<1x8x128xf32, #tpu.memory_space<vmem>>, vector<1x8x128xf32>
    %28 = vector.shape_cast %27 : vector<1x8x128xf32> to vector<8x128xf32>
    %29 = vector.shape_cast %26 : vector<8x128xf32> to vector<1x8x128xf32>
    tpu.vector_store %arg4[%c0_9, %c0_10, %c0_11], %29 {strides = array<i32>} : memref<1x8x128xf32, #tpu.memory_space<vmem>>, vector<1x8x128xf32>,
    return
  }
  func.func @transform_0(%arg0: i32, %arg1: i32, %arg2: memref<1xi32, #tpu.memory_space<smem>>) -> (i32, i32) {
    %c1_i32 = arith.constant 1 : i32
    %0 = arith.muli %arg0, %c1_i32 : i32
    %1 = arith.addi %0, %arg1 : i32
    %c0_i32 = arith.constant 0 : i32
    %2 = arith.minsi %1, %c0_i32 : i32
    %c0_i32_0 = arith.constant 0 : i32
    %c0_i32_1 = arith.constant 0 : i32
    return %2, %c0_i32_0 : i32, i32
  }
  func.func @transform_1(%arg0: i32, %arg1: i32, %arg2: memref<1xi32, #tpu.memory_space<smem>>) -> (i32, i32, i32) {
    %c0_i32 = arith.constant 0 : i32
    %c0_i32_0 = arith.constant 0 : i32
    %c0_i32_1 = arith.constant 0 : i32
    return %arg0, %c0_i32, %c0_i32_0 : i32, i32, i32
  }
}

</mosaic_0001>

<bundles_post_ra>
// kernel: tpu_custom_call.1
= control target key start
LH: loop header
LB: loop body
LE: loop exit
PB: predicated region body
PF: predicated region fallthrough
CT: control target
= control target key end

     0   :  { %v46_v0 = vlaneseq  ;;  %s147_s0 = inlined_call_operand.<no memory space> [shape: s32[1], index: 0, kind: input, shape index: {}]   ;;  %s148_s1 = inlined_call_operand.vmem [shape: f32[2,128], index: 1, kind: input, shape index: {}]   ;;  %s149_s2 = inlined_call_operand.hbm [shape: f32[1,8,128], index: 2, kind: output, shape index: {}]  }
   0x1   :  { %8 = vsyncpa [#allocation5], 0  ;;  %v51_v1 = vstv %s147_s0  ;;  %v43_v2 = vld [vmem:[%s148_s1] sm:$0x3]  ;;  %vm55_vm0 = vcmask 1041408   ;;  %s113_s13 = smov [#allocation4]  }
   0x2   :  { %v47_v3 = vshrl.u32 %v46_v0, 7  ;;  %s73_s14 = sshll.u32 %s113_s13, 4  ;;  %s74_s14 = int_to_ptr.vmem [resolvable:$true] %s73_s14 }
   0x3   :  { %s89_s0 = scalar_lea.vmem %s74_s14, 128  ;;  %p94_p1 = scmp.lt.s32.totalorder %s74_s14, %s74_s14 }
   0x4   :  { %vm52_vm1 = vcmp.lt.s32.totalorder %v47_v3, %v51_v1  ;;  %vm54_vm2 = vcmp.eq.s32.totalorder %v47_v3, 0  ;;  %p90_p0 = scmp.ne.s32.totalorder %s74_s14, %s89_s0  ;;  %p95_p2 = scmp.lt.s32.totalorder %s89_s0, %s89_s0 }
   0x5   :  { %v53_v4 = vsel %vm52_vm1, %v43_v2, 0.0 }
   0x6   :  { %v56_v5 = vsel %vm55_vm0, %v53_v4, 0.0  ;;  %p96_p3 = por %p95_p2, %p94_p1 }
   0x7   :  { %v57_v6 = vrot.slane %v56_v5, 4 }
   0x8   :  { %p97_p4 = pnand %p96_p3, %p90_p0 }
   0x9   :  { %v58_v7 = vadd.f32 %v57_v6, %v56_v5 }
   0xb   :  { %v59_v8 = vrot.slane %v58_v7, 2 }
   0xd   :  { %v60_v9 = vadd.f32 %v59_v8, %v58_v7 }
   0xf   :  { %v61_v10 = vrot.slane %v60_v9, 1 }
  0x11   :  { %v62_v11 = vadd.f32 %v61_v10, %v60_v9 }
  0x13   :  { %v63_v12 = vsel %vm54_vm2, %v62_v11, 0.0 }
  0x14   :  { %66 = vst [vmem:[#allocation4] sm:$0xff] %v63_v12 }
  0x15   :  { %100 = shalt.err (!%p97_p4)
}
  0x16   :  { %s101_s16 = scalar_lea.hbm %s149_s2, 128 }
  0x17   :  { %p102_p5 = scmp.ne.s32.totalorder %s149_s2, %s101_s16  ;;  %p105_p6 = scmp.lt.u32.totalorder %s101_s16, %s149_s2 }
  0x19   :  { %p107_p7 = pnand %p105_p6, %p102_p5 }
  0x1b   :  { %110 = shalt.err (!%p107_p7)
}
  0x1c   :  { %76 = dma.vmem_to_hbm [thread:$0]  %s74_s14, 128, %s149_s2, [#allocation5]  }
  0x1d   :  { %111 = dma.done.wait [#allocation5], 128  }
  0x1e   :  { %112 = vsyncadd [#allocation5], 4294967168 }
  0x1f   :  { %80 = vsyncpa [#allocation5], 1 }

</bundles_post_ra>
